<compile_context>
chip_gen: v7x
topology: tpu7x:2x2x1
jax: 0.10.0
libtpu: 0.0.40
codegen_flags: <defaults>
</compile_context>

<pallas_src>
import functools
import math

import jax
import jax.numpy as jnp
from jax.experimental import pallas as pl
from jax.experimental.pallas import tpu as pltpu

BN_EPS = 1e-5
LEAKY_SLOPE = 0.01                                   # torch LeakyReLU default
INV_STD = float(1.0 / math.sqrt(1.0 + BN_EPS))       # eval BN, fresh running stats
NEG = -1e30                                          # "minus inf" for padded vocab cols


def _leaky_relu(x):
    return jnp.where(x >= 0, x, LEAKY_SLOPE * x)


def _round_up(n, m):
    return ((n + m - 1) // m) * m


# --------------------------------------------------------------------------
# Kernel 1: encoder MLP + fused LogNormal head + softmax over topics
# grid = (batch tiles [parallel], vocab tiles [arbitrary, K-reduction of x@W1])
# --------------------------------------------------------------------------
def _encoder_kernel(x_ref, w1_ref, b1_ref, w2_ref, b2_ref, w3_ref, b3_ref,
                    wh_ref, bh_ref, mu_ref, sigma_ref, zsm_ref, acc_ref,
                    *, num_topics):
    k = pl.program_id(1)

    @pl.when(k == 0)
    def _():
        acc_ref[...] = jnp.zeros_like(acc_ref)

    # vocab-tiled reduction of the largest matmul (x @ W1), f32 accumulator
    acc_ref[...] += jnp.dot(x_ref[...], w1_ref[...],
                            preferred_element_type=jnp.float32)

    @pl.when(k == pl.num_programs(1) - 1)
    def _():
        h = _leaky_relu(acc_ref[...] + b1_ref[...])
        h = _leaky_relu(jnp.dot(h.astype(jnp.bfloat16), w2_ref[...],
                                preferred_element_type=jnp.float32) + b2_ref[...])
        h = _leaky_relu(jnp.dot(h.astype(jnp.bfloat16), w3_ref[...],
                                preferred_element_type=jnp.float32) + b3_ref[...])

        # fused mean / log-var head: single MXU pass over [H3p, 2*Tp]
        head = (jnp.dot(h.astype(jnp.bfloat16), wh_ref[...],
                        preferred_element_type=jnp.float32) + bh_ref[...]) * INV_STD
        tp = mu_ref.shape[-1]
        mu = head[:, :tp]
        sigma = jnp.exp(0.5 * head[:, tp:])
        mu_ref[...] = mu
        sigma_ref[...] = sigma

        # LogNormal mean, then softmax over the (padded) topic axis
        z = jnp.exp(mu + 0.5 * sigma * sigma)
        col = jax.lax.broadcasted_iota(jnp.int32, z.shape, 1)
        z = jnp.where(col < num_topics, z, NEG)        # mask padded topic lanes
        z = z - jnp.max(z, axis=1, keepdims=True)
        ez = jnp.exp(z)
        denom = jnp.sum(ez, axis=1, keepdims=True)
        zsm_ref[...] = ez * pl.reciprocal(denom, approx=True)


# --------------------------------------------------------------------------
# Kernel 2: decoder online logsumexp over the vocab axis
# grid = (batch tiles [parallel], vocab tiles [arbitrary])
# --------------------------------------------------------------------------
def _decoder_lse_kernel(z_ref, wd_ref, bd_ref, lse_ref, m_sc, l_sc):
    v = pl.program_id(1)

    @pl.when(v == 0)
    def _():
        m_sc[...] = jnp.full_like(m_sc, NEG)
        l_sc[...] = jnp.zeros_like(l_sc)

    logits = (jnp.dot(z_ref[...].astype(jnp.bfloat16), wd_ref[...],
                      preferred_element_type=jnp.float32) + bd_ref[...]) * INV_STD
    m_prev = m_sc[...]
    m_new = jnp.maximum(m_prev, jnp.max(logits, axis=1, keepdims=True))
    alpha = jnp.exp(m_prev - m_new)
    l_sc[...] = alpha * l_sc[...] + jnp.sum(jnp.exp(logits - m_new),
                                            axis=1, keepdims=True)
    m_sc[...] = m_new

    @pl.when(v == pl.num_programs(1) - 1)
    def _():
        lse = m_sc[...] + jnp.log(l_sc[...])
        lse_ref[...] = jnp.broadcast_to(lse, lse_ref.shape)   # lane-dense store


# --------------------------------------------------------------------------
# Kernel 3: decoder output, recon = logits - lse (log_softmax), per vocab tile
# (logits are recomputed — cheaper than round-tripping the [B,V] slab to HBM)
# --------------------------------------------------------------------------
def _decoder_out_kernel(z_ref, wd_ref, bd_ref, lse_ref, recon_ref):
    logits = (jnp.dot(z_ref[...].astype(jnp.bfloat16), wd_ref[...],
                      preferred_element_type=jnp.float32) + bd_ref[...]) * INV_STD
    recon_ref[...] = logits - lse_ref[:, 0:1]


# --------------------------------------------------------------------------
# Wrapper: pad to lane-friendly shapes, cast matmul operands to bf16, call kernels
# --------------------------------------------------------------------------
def vae_forward(x, params, num_topics, *, block_b=256, block_v=512,
                vmem_limit_bytes=48 * 1024 * 1024):
    """x: [B, vocab] f32. Returns (recon [B,vocab], mu [B,T], sigma [B,T])."""
    B, V = x.shape
    H1 = params["w1"].shape[1]
    H2 = params["w2"].shape[1]
    H3 = params["w3"].shape[1]
    T = num_topics

    TB = min(block_b, _round_up(B, 8))
    Bp = _round_up(B, TB)
    TV = min(block_v, _round_up(V, 128))
    Vp = _round_up(V, TV)
    H1p, H2p, H3p = (_round_up(h, 128) for h in (H1, H2, H3))
    Tp = _round_up(T, 128)

    f32, bf16 = jnp.float32, jnp.bfloat16

    def pad2(a, r, c, fill=0.0):
        return jnp.pad(a, ((0, r - a.shape[0]), (0, c - a.shape[1])),
                       constant_values=fill)

    xp = pad2(x.astype(f32), Bp, Vp).astype(bf16)
    w1 = pad2(params["w1"], Vp, H1p).astype(bf16)
    w2 = pad2(params["w2"], H1p, H2p).astype(bf16)
    w3 = pad2(params["w3"], H2p, H3p).astype(bf16)
    # fused LogNormal head weight [H3p, 2*Tp]: cols [0:Tp) mean, [Tp:2Tp) log-var
    wh = jnp.concatenate([pad2(params["wm"], H3p, Tp),
                          pad2(params["wv"], H3p, Tp)], axis=1).astype(bf16)
    bh = jnp.concatenate([pad2(params["bm"], 1, Tp),
                          pad2(params["bv"], 1, Tp)], axis=1).astype(f32)
    b1 = pad2(params["b1"], 1, H1p).astype(f32)
    b2 = pad2(params["b2"], 1, H2p).astype(f32)
    b3 = pad2(params["b3"], 1, H3p).astype(f32)
    wd = pad2(params["wd"], Tp, Vp).astype(bf16)
    # padded vocab columns get a -inf-like bias so they never pollute logsumexp
    bd = pad2(params["bd"], 1, Vp, fill=NEG).astype(f32)

    nb = Bp // TB
    nkv = Vp // TV

    # ---------------- encoder + LogNormal head + topic softmax ----------------
    enc_flops = 2 * Bp * Vp * H1p + 2 * Bp * (H1p * H2p + H2p * H3p + H3p * 2 * Tp)
    enc_bytes = ((xp.size + w1.size + w2.size + w3.size + wh.size) * 2
                 + (b1.size + b2.size + b3.size + bh.size) * 4
                 + 3 * Bp * Tp * 4)
    mu_p, sigma_p, zsm_p = pl.pallas_call(
        functools.partial(_encoder_kernel, num_topics=T),
        out_shape=(jax.ShapeDtypeStruct((Bp, Tp), f32),
                   jax.ShapeDtypeStruct((Bp, Tp), f32),
                   jax.ShapeDtypeStruct((Bp, Tp), f32)),
        grid_spec=pltpu.PrefetchScalarGridSpec(
            num_scalar_prefetch=0,
            grid=(nb, nkv),
            in_specs=[
                pl.BlockSpec((TB, TV), lambda b, k: (b, k)),       # x tile
                pl.BlockSpec((TV, H1p), lambda b, k: (k, 0)),      # w1 vocab slice
                pl.BlockSpec((1, H1p), lambda b, k: (0, 0)),       # b1 (resident)
                pl.BlockSpec((H1p, H2p), lambda b, k: (0, 0)),     # w2 (resident)
                pl.BlockSpec((1, H2p), lambda b, k: (0, 0)),
                pl.BlockSpec((H2p, H3p), lambda b, k: (0, 0)),     # w3 (resident)
                pl.BlockSpec((1, H3p), lambda b, k: (0, 0)),
                pl.BlockSpec((H3p, 2 * Tp), lambda b, k: (0, 0)),  # fused head
                pl.BlockSpec((1, 2 * Tp), lambda b, k: (0, 0)),
            ],
            out_specs=(
                pl.BlockSpec((TB, Tp), lambda b, k: (b, 0)),       # mu
                pl.BlockSpec((TB, Tp), lambda b, k: (b, 0)),       # sigma
                pl.BlockSpec((TB, Tp), lambda b, k: (b, 0)),       # softmax(z)
            ),
            scratch_shapes=[pltpu.VMEM((TB, H1p), jnp.float32)],
        ),
        compiler_params=pltpu.CompilerParams(
            dimension_semantics=("parallel", "arbitrary"),
            vmem_limit_bytes=vmem_limit_bytes),
        cost_estimate=pl.CostEstimate(flops=enc_flops,
                                      transcendentals=4 * Bp * Tp,
                                      bytes_accessed=enc_bytes),
    )(xp, w1, b1, w2, b2, w3, b3, wh, bh)

    # ---------------- decoder: online logsumexp over vocab --------------------
    dec_flops = 2 * Bp * Tp * Vp
    dec_bytes = zsm_p.size * 4 + wd.size * 2 + bd.size * 4 + Bp * 128 * 4
    lse = pl.pallas_call(
        _decoder_lse_kernel,
        out_shape=jax.ShapeDtypeStruct((Bp, 128), f32),
        grid_spec=pltpu.PrefetchScalarGridSpec(
            num_scalar_prefetch=0,
            grid=(nb, nkv),
            in_specs=[
                pl.BlockSpec((TB, Tp), lambda b, v: (b, 0)),       # softmax(z)
                pl.BlockSpec((Tp, TV), lambda b, v: (0, v)),       # wd vocab slice
                pl.BlockSpec((1, TV), lambda b, v: (0, v)),        # bd vocab slice
            ],
            out_specs=pl.BlockSpec((TB, 128), lambda b, v: (b, 0)),
            scratch_shapes=[pltpu.VMEM((TB, 1), jnp.float32),
                            pltpu.VMEM((TB, 1), jnp.float32)],
        ),
        compiler_params=pltpu.CompilerParams(
            dimension_semantics=("parallel", "arbitrary"),
            vmem_limit_bytes=vmem_limit_bytes),
        cost_estimate=pl.CostEstimate(flops=dec_flops,
                                      transcendentals=Bp * Vp,
                                      bytes_accessed=dec_bytes),
    )(zsm_p, wd, bd)

    # ---------------- decoder: recon = logits - lse (log_softmax) -------------
    recon_p = pl.pallas_call(
        _decoder_out_kernel,
        out_shape=jax.ShapeDtypeStruct((Bp, Vp), f32),
        grid_spec=pltpu.PrefetchScalarGridSpec(
            num_scalar_prefetch=0,
            grid=(nb, nkv),
            in_specs=[
                pl.BlockSpec((TB, Tp), lambda b, v: (b, 0)),
                pl.BlockSpec((Tp, TV), lambda b, v: (0, v)),
                pl.BlockSpec((1, TV), lambda b, v: (0, v)),
                pl.BlockSpec((TB, 128), lambda b, v: (b, 0)),
            ],
            out_specs=pl.BlockSpec((TB, TV), lambda b, v: (b, v)),
        ),
        compiler_params=pltpu.CompilerParams(
            dimension_semantics=("parallel", "parallel"),
            vmem_limit_bytes=vmem_limit_bytes),
        cost_estimate=pl.CostEstimate(flops=dec_flops, transcendentals=0,
                                      bytes_accessed=dec_bytes + Bp * Vp * 4),
    )(zsm_p, wd, bd, lse)

    return recon_p[:B, :V], mu_p[:B, :T], sigma_p[:B, :T]


# ------------------------- parameter init (deterministic) -------------------------
def _linear_params(key, fan_in, fan_out):
    # torch.nn.Linear default init: U(-1/sqrt(fan_in), 1/sqrt(fan_in))
    kw, kb = jax.random.split(key)
    bound = 1.0 / math.sqrt(float(fan_in))
    w = jax.random.uniform(kw, (fan_in, fan_out), jnp.float32, -bound, bound)
    b = jax.random.uniform(kb, (1, fan_out), jnp.float32, -bound, bound)
    return w, b


def init_vae_params(key, vocab_size, hidden_size, num_topics):
    keys = jax.random.split(key, 6)
    w1, b1 = _linear_params(keys[0], vocab_size, hidden_size[0])
    w2, b2 = _linear_params(keys[1], hidden_size[0], hidden_size[1])
    w3, b3 = _linear_params(keys[2], hidden_size[1], hidden_size[2])
    wm, bm = _linear_params(keys[3], hidden_size[2], num_topics)
    wv, bv = _linear_params(keys[4], hidden_size[2], num_topics)
    wd, bd = _linear_params(keys[5], num_topics, vocab_size)
    return dict(w1=w1, b1=b1, w2=w2, b2=b2, w3=w3, b3=b3,
                wm=wm, bm=bm, wv=wv, bv=bv, wd=wd, bd=bd)


# ------------------------- plain-JAX reference (mirrors kernel numerics) ----------
def vae_forward_ref(x, p):
    def bf(a):  # mirror the bf16 rounding of MXU operands, keep f32 accumulation
        return a.astype(jnp.bfloat16).astype(jnp.float32)
    inv = INV_STD
    h = _leaky_relu(bf(x) @ bf(p["w1"]) + p["b1"])
    h = _leaky_relu(bf(h) @ bf(p["w2"]) + p["b2"])
    h = _leaky_relu(bf(h) @ bf(p["w3"]) + p["b3"])
    mu = (bf(h) @ bf(p["wm"]) + p["bm"]) * inv
    sigma = jnp.exp(0.5 * ((bf(h) @ bf(p["wv"]) + p["bv"]) * inv))
    z = jnp.exp(mu + 0.5 * sigma ** 2)
    z_sm = jax.nn.softmax(z, axis=1)
    logits = (bf(z_sm) @ bf(p["wd"]) + p["bd"]) * inv
    recon = jax.nn.log_softmax(logits, axis=1)
    return recon, mu, sigma


if __name__ == "__main__":
    # small shapes consistent with the module's forward (non-multiples exercise padding,
    # V > block_v exercises the vocab-tiled reduction and online logsumexp)
    B, VOCAB, NUM_TOPICS = 16, 1000, 20
    HIDDEN = (100, 64, 50)

    key = jax.random.PRNGKey(0)
    k_params, k_x = jax.random.split(key)
    params = init_vae_params(k_params, VOCAB, HIDDEN, NUM_TOPICS)
    # bag-of-words style non-negative input
    x = jax.random.uniform(k_x, (B, VOCAB), jnp.float32, 0.0, 5.0)

    recon, mu, sigma = jax.block_until_ready(vae_forward(x, params, NUM_TOPICS))

    recon_r, mu_r, sigma_r = vae_forward_ref(x, params)
    assert recon.shape == (B, VOCAB) and mu.shape == (B, NUM_TOPICS)
    assert bool(jnp.all(jnp.isfinite(recon)))
    assert jnp.allclose(recon, recon_r, atol=2e-2, rtol=2e-2)
    assert jnp.allclose(mu, mu_r, atol=2e-2, rtol=2e-2)
    assert jnp.allclose(sigma, sigma_r, atol=2e-2, rtol=2e-2)

    # TODO(synk): training-mode paths (Dropout masks, batch-stat BatchNorm,
    # dist.rsample()) and non-fresh BatchNorm running stats are not implemented;
    # eval-mode forward with freshly-initialized running stats only.
    print("KERNEL_OK")
</pallas_src>

<mosaic_0001>
module attributes {stable_mosaic.version = 11 : i64} {
  func.func @_encoder_kernel(%arg0: i32, %arg1: i32, %arg2: memref<16x512xbf16, #tpu.memory_space<vmem>>, %arg3: memref<512x128xbf16, #tpu.memory_space<vmem>>, %arg4: memref<1x128xf32, #tpu.memory_space<vmem>>, %arg5: memref<128x128xbf16, #tpu.memory_space<vmem>>, %arg6: memref<1x128xf32, #tpu.memory_space<vmem>>, %arg7: memref<128x128xbf16, #tpu.memory_space<vmem>>, %arg8: memref<1x128xf32, #tpu.memory_space<vmem>>, %arg9: memref<128x256xbf16, #tpu.memory_space<vmem>>, %arg10: memref<1x256xf32, #tpu.memory_space<vmem>>, %arg11: memref<16x128xf32, #tpu.memory_space<vmem>>, %arg12: memref<16x128xf32, #tpu.memory_space<vmem>>, %arg13: memref<16x128xf32, #tpu.memory_space<vmem>>, %arg14: memref<16x128xf32, #tpu.memory_space<vmem>>) attributes {dimension_semantics = [#tpu.dimension_semantics<parallel>, #tpu.dimension_semantics<arbitrary>], iteration_bounds = array<i64: 1, 2>, scalar_prefetch = 0 : i64, scratch_operands = 1 : i64, tpu.core_type = #tpu.core_type<tc>, window_params = [{transform_indices = @transform_0, window_bounds = array<i64: 16, 512>}, {transform_indices = @transform_1, window_bounds = array<i64: 512, 128>}, {pipeline_mode = #tpu.pipeline_mode<synchronous>, transform_indices = @transform_2, window_bounds = array<i64: 1, 128>}, {pipeline_mode = #tpu.pipeline_mode<synchronous>, transform_indices = @transform_3, window_bounds = array<i64: 128, 128>}, {pipeline_mode = #tpu.pipeline_mode<synchronous>, transform_indices = @transform_4, window_bounds = array<i64: 1, 128>}, {pipeline_mode = #tpu.pipeline_mode<synchronous>, transform_indices = @transform_5, window_bounds = array<i64: 128, 128>}, {pipeline_mode = #tpu.pipeline_mode<synchronous>, transform_indices = @transform_6, window_bounds = array<i64: 1, 128>}, {pipeline_mode = #tpu.pipeline_mode<synchronous>, transform_indices = @transform_7, window_bounds = array<i64: 128, 256>}, {pipeline_mode = #tpu.pipeline_mode<synchronous>, transform_indices = @transform_8, window_bounds = array<i64: 1, 256>}, {transform_indices = @transform_9, window_bounds = array<i64: 16, 128>}, {transform_indices = @transform_10, window_bounds = array<i64: 16, 128>}, {transform_indices = @transform_11, window_bounds = array<i64: 16, 128>}]} {
    %c0_i32 = arith.constant 0 : i32
    %0 = arith.cmpi eq, %arg1, %c0_i32 : i32
    %1 = arith.extui %0 : i1 to i32
    %c0_i32_0 = arith.constant 0 : i32
    %2 = arith.cmpi ne, %1, %c0_i32_0 : i32
    scf.if %2 {
      %cst_9 = arith.constant 0.000000e+00 : f32
      %12 = vector.broadcast %cst_9 : f32 to vector<16x128xf32>
      %c0_10 = arith.constant 0 : index
      %c0_11 = arith.constant 0 : index
      %13 = vector.load %arg14[%c0_10, %c0_11] : memref<16x128xf32, #tpu.memory_space<vmem>>, vector<16x128xf32>
      tpu.vector_store %arg14[%c0_10, %c0_11], %12 {strides = array<i32>} : memref<16x128xf32, #tpu.memory_space<vmem>>, vector<16x128xf32>,
    } else {
    }
    %c0 = arith.constant 0 : index
    %c0_1 = arith.constant 0 : index
    %3 = vector.load %arg14[%c0, %c0_1] : memref<16x128xf32, #tpu.memory_space<vmem>>, vector<16x128xf32>
    %c0_2 = arith.constant 0 : index
    %c0_3 = arith.constant 0 : index
    %4 = vector.load %arg2[%c0_2, %c0_3] : memref<16x512xbf16, #tpu.memory_space<vmem>>, vector<16x512xbf16>
    %c0_4 = arith.constant 0 : index
    %c0_5 = arith.constant 0 : index
    %5 = vector.load %arg3[%c0_4, %c0_5] : memref<512x128xbf16, #tpu.memory_space<vmem>>, vector<512x128xbf16>
    %cst = arith.constant dense<0.000000e+00> : vector<16x128xf32>
    %6 = tpu.matmul %4, %5, %cst {dimension_numbers = #tpu.dot_dimension_numbers<[1], [0], [0], [1], [0, 0, 1, 1], [], []>} : vector<16x512xbf16>, vector<512x128xbf16>, vector<16x128xf32> -> vector<16x128xf32>
    %7 = arith.addf %3, %6 : vector<16x128xf32>
    %c0_6 = arith.constant 0 : index
    %c0_7 = arith.constant 0 : index
    %8 = vector.load %arg14[%c0_6, %c0_7] : memref<16x128xf32, #tpu.memory_space<vmem>>, vector<16x128xf32>
    tpu.vector_store %arg14[%c0_6, %c0_7], %7 {strides = array<i32>} : memref<16x128xf32, #tpu.memory_space<vmem>>, vector<16x128xf32>,
    %c1_i32 = arith.constant 1 : i32
    %9 = arith.cmpi eq, %arg1, %c1_i32 : i32
    %10 = arith.extui %9 : i1 to i32
    %c0_i32_8 = arith.constant 0 : i32
    %11 = arith.cmpi ne, %10, %c0_i32_8 : i32
    scf.if %11 {
      %c0_9 = arith.constant 0 : index
      %c0_10 = arith.constant 0 : index
      %12 = vector.load %arg14[%c0_9, %c0_10] : memref<16x128xf32, #tpu.memory_space<vmem>>, vector<16x128xf32>
      %c0_11 = arith.constant 0 : index
      %c0_12 = arith.constant 0 : index
      %13 = vector.load %arg4[%c0_11, %c0_12] : memref<1x128xf32, #tpu.memory_space<vmem>>, vector<1x128xf32>
      %14 = vector.broadcast %13 : vector<1x128xf32> to vector<16x128xf32>
      %15 = arith.addf %12, %14 : vector<16x128xf32>
      %cst_13 = arith.constant 0.000000e+00 : f32
      %16 = vector.broadcast %cst_13 : f32 to vector<16x128xf32>
      %17 = arith.cmpf oge, %15, %16 : vector<16x128xf32>
      %cst_14 = arith.constant 0.00999999977 : f32
      %18 = vector.broadcast %cst_14 : f32 to vector<16x128xf32>
      %19 = arith.mulf %18, %15 : vector<16x128xf32>
      %20 = arith.select %17, %15, %19 : vector<16x128xi1>, vector<16x128xf32>
      %21 = arith.truncf %20 : vector<16x128xf32> to vector<16x128xbf16>
      %c0_15 = arith.constant 0 : index
      %c0_16 = arith.constant 0 : index
      %22 = vector.load %arg5[%c0_15, %c0_16] : memref<128x128xbf16, #tpu.memory_space<vmem>>, vector<128x128xbf16>
      %cst_17 = arith.constant dense<0.000000e+00> : vector<16x128xf32>
      %23 = tpu.matmul %21, %22, %cst_17 {dimension_numbers = #tpu.dot_dimension_numbers<[1], [0], [0], [1], [0, 0, 1, 1], [], []>} : vector<16x128xbf16>, vector<128x128xbf16>, vector<16x128xf32> -> vector<16x128xf32>
      %c0_18 = arith.constant 0 : index
      %c0_19 = arith.constant 0 : index
      %24 = vector.load %arg6[%c0_18, %c0_19] : memref<1x128xf32, #tpu.memory_space<vmem>>, vector<1x128xf32>
      %25 = vector.broadcast %24 : vector<1x128xf32> to vector<16x128xf32>
      %26 = arith.addf %23, %25 : vector<16x128xf32>
      %cst_20 = arith.constant 0.000000e+00 : f32
      %27 = vector.broadcast %cst_20 : f32 to vector<16x128xf32>
      %28 = arith.cmpf oge, %26, %27 : vector<16x128xf32>
      %cst_21 = arith.constant 0.00999999977 : f32
      %29 = vector.broadcast %cst_21 : f32 to vector<16x128xf32>
      %30 = arith.mulf %29, %26 : vector<16x128xf32>
      %31 = arith.select %28, %26, %30 : vector<16x128xi1>, vector<16x128xf32>
      %32 = arith.truncf %31 : vector<16x128xf32> to vector<16x128xbf16>
      %c0_22 = arith.constant 0 : index
      %c0_23 = arith.constant 0 : index
      %33 = vector.load %arg7[%c0_22, %c0_23] : memref<128x128xbf16, #tpu.memory_space<vmem>>, vector<128x128xbf16>
      %cst_24 = arith.constant dense<0.000000e+00> : vector<16x128xf32>
      %34 = tpu.matmul %32, %33, %cst_24 {dimension_numbers = #tpu.dot_dimension_numbers<[1], [0], [0], [1], [0, 0, 1, 1], [], []>} : vector<16x128xbf16>, vector<128x128xbf16>, vector<16x128xf32> -> vector<16x128xf32>
      %c0_25 = arith.constant 0 : index
      %c0_26 = arith.constant 0 : index
      %35 = vector.load %arg8[%c0_25, %c0_26] : memref<1x128xf32, #tpu.memory_space<vmem>>, vector<1x128xf32>
      %36 = vector.broadcast %35 : vector<1x128xf32> to vector<16x128xf32>
      %37 = arith.addf %34, %36 : vector<16x128xf32>
      %cst_27 = arith.constant 0.000000e+00 : f32
      %38 = vector.broadcast %cst_27 : f32 to vector<16x128xf32>
      %39 = arith.cmpf oge, %37, %38 : vector<16x128xf32>
      %cst_28 = arith.constant 0.00999999977 : f32
      %40 = vector.broadcast %cst_28 : f32 to vector<16x128xf32>
      %41 = arith.mulf %40, %37 : vector<16x128xf32>
      %42 = arith.select %39, %37, %41 : vector<16x128xi1>, vector<16x128xf32>
      %43 = arith.truncf %42 : vector<16x128xf32> to vector<16x128xbf16>
      %c0_29 = arith.constant 0 : index
      %c0_30 = arith.constant 0 : index
      %44 = vector.load %arg9[%c0_29, %c0_30] : memref<128x256xbf16, #tpu.memory_space<vmem>>, vector<128x256xbf16>
      %cst_31 = arith.constant dense<0.000000e+00> : vector<16x256xf32>
      %45 = tpu.matmul %43, %44, %cst_31 {dimension_numbers = #tpu.dot_dimension_numbers<[1], [0], [0], [1], [0, 0, 1, 1], [], []>} : vector<16x128xbf16>, vector<128x256xbf16>, vector<16x256xf32> -> vector<16x256xf32>
      %c0_32 = arith.constant 0 : index
      %c0_33 = arith.constant 0 : index
      %46 = vector.load %arg10[%c0_32, %c0_33] : memref<1x256xf32, #tpu.memory_space<vmem>>, vector<1x256xf32>
      %47 = vector.broadcast %46 : vector<1x256xf32> to vector<16x256xf32>
      %48 = arith.addf %45, %47 : vector<16x256xf32>
      %cst_34 = arith.constant 0.999994993 : f32
      %49 = vector.broadcast %cst_34 : f32 to vector<16x256xf32>
      %50 = arith.mulf %48, %49 : vector<16x256xf32>
      %51 = vector.extract_strided_slice %50 {offsets = [0, 0], sizes = [16, 128], strides = [1, 1]} : vector<16x256xf32> to vector<16x128xf32>
      %52 = vector.extract_strided_slice %50 {offsets = [0, 128], sizes = [16, 128], strides = [1, 1]} : vector<16x256xf32> to vector<16x128xf32>
      %cst_35 = arith.constant 5.000000e-01 : f32
      %53 = vector.broadcast %cst_35 : f32 to vector<16x128xf32>
      %54 = arith.mulf %53, %52 : vector<16x128xf32>
      %55 = math.exp %54 : vector<16x128xf32>
      %c0_36 = arith.constant 0 : index
      %c0_37 = arith.constant 0 : index
      %56 = vector.load %arg11[%c0_36, %c0_37] : memref<16x128xf32, #tpu.memory_space<vmem>>, vector<16x128xf32>
      tpu.vector_store %arg11[%c0_36, %c0_37], %51 {strides = array<i32>} : memref<16x128xf32, #tpu.memory_space<vmem>>, vector<16x128xf32>,
      %c0_38 = arith.constant 0 : index
      %c0_39 = arith.constant 0 : index
      %57 = vector.load %arg12[%c0_38, %c0_39] : memref<16x128xf32, #tpu.memory_space<vmem>>, vector<16x128xf32>
      tpu.vector_store %arg12[%c0_38, %c0_39], %55 {strides = array<i32>} : memref<16x128xf32, #tpu.memory_space<vmem>>, vector<16x128xf32>,
      %cst_40 = arith.constant 5.000000e-01 : f32
      %58 = vector.broadcast %cst_40 : f32 to vector<16x128xf32>
      %59 = arith.mulf %58, %55 : vector<16x128xf32>
      %60 = arith.mulf %59, %55 : vector<16x128xf32>
      %61 = arith.addf %51, %60 : vector<16x128xf32>
      %62 = math.exp %61 : vector<16x128xf32>
      %63 = tpu.iota {dimensions = array<i32: 1>} : vector<16x128xi32>
      %c20_i32 = arith.constant 20 : i32
      %64 = vector.broadcast %c20_i32 : i32 to vector<16x128xi32>
      %65 = arith.cmpi slt, %63, %64 : vector<16x128xi32>
      %cst_41 = arith.constant -1.000000e+30 : f32
      %66 = vector.broadcast %cst_41 : f32 to vector<16x128xf32>
      %67 = arith.select %65, %62, %66 : vector<16x128xi1>, vector<16x128xf32>
      %cst_42 = arith.constant dense<0xFF800000> : vector<16xf32>
      %68 = vector.multi_reduction <maximumf>, %67, %cst_42 [1] : vector<16x128xf32> to vector<16xf32>
      %69 = vector.shape_cast %68 : vector<16xf32> to vector<16x1xf32>
      %70 = vector.broadcast %69 : vector<16x1xf32> to vector<16x128xf32>
      %71 = arith.subf %67, %70 : vector<16x128xf32>
      %72 = math.exp %71 : vector<16x128xf32>
      %cst_43 = arith.constant dense<0.000000e+00> : vector<16xf32>
      %73 = vector.multi_reduction <add>, %72, %cst_43 [1] : vector<16x128xf32> to vector<16xf32>
      %74 = vector.shape_cast %73 : vector<16xf32> to vector<16x1xf32>
      %75 = tpu.reciprocal %74 {approx = true} : vector<16x1xf32> -> vector<16x1xf32>
      %76 = vector.broadcast %75 : vector<16x1xf32> to vector<16x128xf32>
      %77 = arith.mulf %72, %76 : vector<16x128xf32>
      %c0_44 = arith.constant 0 : index
      %c0_45 = arith.constant 0 : index
      %78 = vector.load %arg13[%c0_44, %c0_45] : memref<16x128xf32, #tpu.memory_space<vmem>>, vector<16x128xf32>
      tpu.vector_store %arg13[%c0_44, %c0_45], %77 {strides = array<i32>} : memref<16x128xf32, #tpu.memory_space<vmem>>, vector<16x128xf32>,
    } else {
    }
    return
  }
  func.func @transform_0(%arg0: i32, %arg1: i32) -> (i32, i32) {
    %c0_i32 = arith.constant 0 : i32
    return %arg0, %arg1 : i32, i32
  }
  func.func @transform_1(%arg0: i32, %arg1: i32) -> (i32, i32) {
    %c0_i32 = arith.constant 0 : i32
    %c0_i32_0 = arith.constant 0 : i32
    return %arg1, %c0_i32 : i32, i32
  }
  func.func @transform_2(%arg0: i32, %arg1: i32) -> (i32, i32) {
    %c0_i32 = arith.constant 0 : i32
    %c0_i32_0 = arith.constant 0 : i32
    %c0_i32_1 = arith.constant 0 : i32
    return %c0_i32, %c0_i32_0 : i32, i32
  }
  func.func @transform_3(%arg0: i32, %arg1: i32) -> (i32, i32) {
    %c0_i32 = arith.constant 0 : i32
    %c0_i32_0 = arith.constant 0 : i32
    %c0_i32_1 = arith.constant 0 : i32
    return %c0_i32, %c0_i32_0 : i32, i32
  }
  func.func @transform_4(%arg0: i32, %arg1: i32) -> (i32, i32) {
    %c0_i32 = arith.constant 0 : i32
    %c0_i32_0 = arith.constant 0 : i32
    %c0_i32_1 = arith.constant 0 : i32
    return %c0_i32, %c0_i32_0 : i32, i32
  }
  func.func @transform_5(%arg0: i32, %arg1: i32) -> (i32, i32) {
    %c0_i32 = arith.constant 0 : i32
    %c0_i32_0 = arith.constant 0 : i32
    %c0_i32_1 = arith.constant 0 : i32
    return %c0_i32, %c0_i32_0 : i32, i32
  }
  func.func @transform_6(%arg0: i32, %arg1: i32) -> (i32, i32) {
    %c0_i32 = arith.constant 0 : i32
    %c0_i32_0 = arith.constant 0 : i32
    %c0_i32_1 = arith.constant 0 : i32
    return %c0_i32, %c0_i32_0 : i32, i32
  }
  func.func @transform_7(%arg0: i32, %arg1: i32) -> (i32, i32) {
    %c0_i32 = arith.constant 0 : i32
    %c0_i32_0 = arith.constant 0 : i32
    %c0_i32_1 = arith.constant 0 : i32
    return %c0_i32, %c0_i32_0 : i32, i32
  }
  func.func @transform_8(%arg0: i32, %arg1: i32) -> (i32, i32) {
    %c0_i32 = arith.constant 0 : i32
    %c0_i32_0 = arith.constant 0 : i32
    %c0_i32_1 = arith.constant 0 : i32
    return %c0_i32, %c0_i32_0 : i32, i32
  }
  func.func @transform_9(%arg0: i32, %arg1: i32) -> (i32, i32) {
    %c0_i32 = arith.constant 0 : i32
    %c0_i32_0 = arith.constant 0 : i32
    return %arg0, %c0_i32 : i32, i32
  }
  func.func @transform_10(%arg0: i32, %arg1: i32) -> (i32, i32) {
    %c0_i32 = arith.constant 0 : i32
    %c0_i32_0 = arith.constant 0 : i32
    return %arg0, %c0_i32 : i32, i32
  }
  func.func @transform_11(%arg0: i32, %arg1: i32) -> (i32, i32) {
    %c0_i32 = arith.constant 0 : i32
    %c0_i32_0 = arith.constant 0 : i32
    return %arg0, %c0_i32 : i32, i32
  }
}

</mosaic_0001>

<bundles_post_ra>
// kernel: tpu_custom_call.1
= control target key start
LH: loop header
LB: loop body
LE: loop exit
PB: predicated region body
PF: predicated region fallthrough
CT: control target
= control target key end

     0   :  { %s2723_s0 = inlined_call_operand.hbm [shape: bf16[16,1024], index: 0, kind: input, shape index: {}]   ;;  %s2724_s1 = inlined_call_operand.hbm [shape: bf16[1024,128], index: 1, kind: input, shape index: {}]   ;;  %s2725_s2 = inlined_call_operand.vmem [shape: f32[1,128], index: 2, kind: input, shape index: {}]   ;;  %s2726_s3 = inlined_call_operand.hbm [shape: bf16[128,128], index: 3, kind: input, shape index: {}]   ;;  %s2727_s4 = inlined_call_operand.vmem [shape: f32[1,128], index: 4, kind: input, shape index: {}]   ;;  %s2728_s5 = inlined_call_operand.hbm [shape: bf16[128,128], index: 5, kind: input, shape index: {}]   ;;  %s2729_s6 = inlined_call_operand.vmem [shape: f32[1,128], index: 6, kind: input, shape index: {}]   ;;  %s2730_s7 = inlined_call_operand.hbm [shape: bf16[128,256], index: 7, kind: input, shape index: {}]   ;;  %s2731_s8 = inlined_call_operand.vmem [shape: f32[1,256], index: 8, kind: input, shape index: {}]   ;;  %s2732_s9 = inlined_call_operand.hbm [shape: f32[16,128], index: 9, kind: output, shape index: {0}]   ;;  %s2733_s10 = inlined_call_operand.hbm [shape: f32[16,128], index: 10, kind: output, shape index: {1}]   ;;  %s2734_s11 = inlined_call_operand.hbm [shape: f32[16,128], index: 11, kind: output, shape index: {2}]  }
   0x1   :  { %2744 = sst [smem:[#allocation22_spill]] %s2723_s0 }
   0x2   :  { %2745 = sst [smem:[#allocation23_spill]] %s2726_s3 }
   0x3   :  { %2746 = sst [smem:[#allocation24_spill]] %s2728_s5 }
   0x4   :  { %2747 = sst [smem:[#allocation25_spill]] %s2729_s6 }
   0x5   :  { %2748 = sst [smem:[#allocation26_spill]] %s2730_s7 }
   0x6   :  { %2749 = sst [smem:[#allocation27_spill]] %s2731_s8 }
   0x7   :  { %2750 = sst [smem:[#allocation28_spill]] %s2732_s9 }
   0x8   :  { %2751 = sst [smem:[#allocation29_spill]] %s2733_s10 }
   0x9   :  { %2752 = sst [smem:[#allocation30_spill]] %s2734_s11 }
   0xa   :  { %17 = vsyncpa [#allocation4], 0 }
   0xb   :  { %19 = vsyncpa [#allocation4 + $0x1], 0 }
   0xc   :  { %20 = vsyncpa [#allocation7], 0 }
   0xd   :  { %22 = vsyncpa [#allocation7 + $0x1], 0 }
   0xe   :  { %23 = vsyncpa [#allocation10], 0 }
   0xf   :  { %24 = vsyncpa [#allocation5], 0 }
  0x10   :  { %25 = vsyncpa [#allocation14], 0  ;;  %s2326_s17 = smov 0   ;;  %s2328_s18 = smov 0  }
  0x11   :  { %s2330_s19 = smov 0   ;;  %s2332_s20 = smov 0  }
  0x12   :  { %s2334_s21 = smov 0   ;;  %s2336_s22 = smov 0  }
  0x13 LB: > { %s2355_s23 = sadd.s32 4294967295, %s2243_s22   ;;  %p59_p0 = scmp.ne.s32.totalorder %s2231_s19, %s2227_s18  ;;  %s2243_s22 = sphi %s2336_s22, %s31_s22   ;;  %s2239_s21 = sphi %s2334_s21, %s2782_s21   ;;  %s2235_s20 = sphi %s2332_s20, %s2781_s20   ;;  %s2231_s19 = sphi %s2330_s19, %s2780_s19   ;;  %s2227_s18 = sphi %s2328_s18, %s2779_s18   ;;  %s2223_s17 = sphi %s2326_s17, %s2778_s17  }
  0x14   : > { %p60_p1 = scmp.eq.s32.totalorder %s2243_s22, 0  ;;  %p65_p2 = scmp.ne.s32.totalorder %s2227_s18, %s2223_s17 }
  0x15   : > { %p2736_p3 = scmp.eq.s32.totalorder %s2355_s23, 0  ;;  %p1530_p5 = scmp.ge.s32.totalorder %s2243_s22, 1 }
  0x16   : > { %p61_p4 = por %p60_p1, %p59_p0  ;;  %p327_p7 = scmp.lt.s32.totalorder %s2243_s22, 3 }
  0x17   : > { %p2366_p6 = por %p2736_p3, %p65_p2  ;;  %s2245_s27 = smov [#allocation8]  }
  0x18   : > { %p2371_p8 = pnand %p1530_p5, %p327_p7  ;;  %s342_s28 = sshll.u32 %s2245_s27, 4  ;;  %s2375_s28 = int_to_ptr.vmem [resolvable:$true] %s342_s28 }
  0x19   : > { %s2753_s25 = scalar_select %p2366_p6, 1, 0 }
  0x1a   : > { %s2754_s26 = scalar_select %p2371_p8, 1, 0 }
  0x1b   : > { %p1760_p9 = pneg %p2371_p8  ;;  %p1780_p10 = scmp.lt.s32.totalorder %s2243_s22, 2 }
  0x1c   : > { %s2246_s12 = smov [#allocation9]   ;;  %s2757_s3 = sld [smem:[#allocation23_spill]] }
  0x1d   : > { %p2382_p11 = pnand %p1760_p9, %p2736_p3  ;;  %p2386_p12 = pnand %p1780_p10, %p61_p4 }
  0x1e   : > { %s358_s13 = sshll.u32 %s2246_s12, 4  ;;  %s2390_s13 = int_to_ptr.vmem [resolvable:$true] %s358_s13 }
  0x1f   : > { %s2756_s30 = scalar_select %p2386_p12, 1, 0 }
  0x20   : > { %p2400_p0 = pneg %p2382_p11 }
  0x22   : > { %s1951_s16 = scalar_lea.hbm %s2757_s3, 1024 }
  0x23   : > { %p1952_p13 = scmp.ne.s32.totalorder %s2757_s3, %s1951_s16  ;;  %p1958_p4 = scmp.lt.u32.totalorder %s1951_s16, %s2757_s3 }
  0x25   : > { %p1954_p1 = pnand %p2400_p0, %p1952_p13 }
  0x27   : > { %p1955_p2 = pneg %p1954_p1 }
  0x29   : > { %p1960_p5 = pnand %p1958_p4, %p1955_p2 }
  0x2b   : > { %1963 = shalt.err (!%p1960_p5)
}
  0x2c   : > { %s1964_s14 = scalar_lea.vmem %s2375_s28, 1024  ;;  %p1972_p3 = scmp.lt.s32.totalorder %s2375_s28, %s2375_s28 }
  0x2d   : > { %p1965_p7 = scmp.ne.s32.totalorder %s2375_s28, %s1964_s14  ;;  %p1973_p6 = scmp.lt.s32.totalorder %s1964_s14, %s1964_s14 }
  0x2f   : > { %p1967_p9 = pnand %p1965_p7, %p2400_p0  ;;  %p1974_p13 = por %p1973_p6, %p1972_p3 }
  0x31   : > { %p1968_p10 = pneg %p1967_p9 }
  0x33   : > { %p1975_p1 = pnand %p1974_p13, %p1968_p10 }
  0x35   : > { %1978 = shalt.err (!%p1975_p1)
}
  0x36   : > { %s2742_s15 = smov 64   ;;  %s2743_s11 = smov 4  }
  0x37   : > { %1763 = dma.hbm_to_vmem [thread:$0]  (!%p2382_p11), %s2757_s3, 1024, %s2375_s28, [#allocation7], %s2742_s15, %s2742_s15, %s2743_s11  }
  0x38   : > { %s2759_s5 = sld [smem:[#allocation24_spill]] }
  0x3e   : > { %s1979_s14 = scalar_lea.hbm %s2759_s5, 1024 }
  0x3f   : > { %p1980_p3 = scmp.ne.s32.totalorder %s2759_s5, %s1979_s14  ;;  %p1986_p4 = scmp.lt.u32.totalorder %s1979_s14, %s2759_s5 }
  0x41   : > { %p1982_p6 = pnand %p1980_p3, %p2400_p0 }
  0x43   : > { %p1983_p2 = pneg %p1982_p6 }
  0x45   : > { %p1988_p5 = pnand %p1986_p4, %p1983_p2 }
  0x47   : > { %1991 = shalt.err (!%p1988_p5)
}
  0x48   : > { %s1992_s28 = scalar_lea.vmem %s2390_s13, 1024  ;;  %p2000_p13 = scmp.lt.s32.totalorder %s2390_s13, %s2390_s13 }
  0x49   : > { %p1993_p7 = scmp.ne.s32.totalorder %s2390_s13, %s1992_s28  ;;  %p2001_p1 = scmp.lt.s32.totalorder %s1992_s28, %s1992_s28 }
  0x4b   : > { %p1995_p9 = pnand %p1993_p7, %p2400_p0  ;;  %p2002_p3 = por %p2001_p1, %p2000_p13 }
  0x4d   : > { %p1996_p10 = pneg %p1995_p9 }
  0x4f   : > { %p2003_p6 = pnand %p2002_p3, %p1996_p10 }
  0x51   : > { %2006 = shalt.err (!%p2003_p6)
}
  0x52   : > { %1766 = dma.hbm_to_vmem [thread:$0]  (!%p2382_p11), %s2759_s5, 1024, %s2390_s13, [#allocation10], %s2742_s15, %s2742_s15, %s2743_s11  }
  0x53   : > { %s2249_s9 = smov [#allocation11]   ;;  %s2760_s7 = sld [smem:[#allocation26_spill]] }
  0x54   : > { %s374_s10 = sshll.u32 %s2249_s9, 4  ;;  %s375_s10 = int_to_ptr.vmem [resolvable:$true] %s374_s10 }
  0x59   : > { %s2007_s27 = scalar_lea.hbm %s2760_s7, 2048 }
  0x5a   : > { %p2008_p2 = scmp.ne.s32.totalorder %s2760_s7, %s2007_s27  ;;  %p2014_p7 = scmp.lt.u32.totalorder %s2007_s27, %s2760_s7 }
  0x5c   : > { %p2010_p4 = pnand %p2008_p2, %p2400_p0 }
  0x5e   : > { %p2011_p5 = pneg %p2010_p4 }
  0x60   : > { %p2016_p9 = pnand %p2014_p7, %p2011_p5 }
  0x62   : > { %2019 = shalt.err (!%p2016_p9)
}
  0x63   : > { %s2020_s13 = scalar_lea.vmem %s375_s10, 2048  ;;  %p2028_p3 = scmp.lt.s32.totalorder %s375_s10, %s375_s10 }
  0x64   : > { %p2021_p10 = scmp.ne.s32.totalorder %s375_s10, %s2020_s13  ;;  %p2029_p6 = scmp.lt.s32.totalorder %s2020_s13, %s2020_s13 }
  0x66   : > { %p2023_p13 = pnand %p2021_p10, %p2400_p0  ;;  %p2030_p8 = por %p2029_p6, %p2028_p3 }
  0x68   : > { %p2024_p1 = pneg %p2023_p13 }
  0x6a   : > { %p2031_p12 = pnand %p2030_p8, %p2024_p1 }
  0x6c   : > { %2034 = shalt.err (!%p2031_p12)
}
  0x6d   : > { %s2250_s6 = smov 128   ;;  %s2251_s3 = smov 8  }
  0x6e   : > { %1769 = dma.hbm_to_vmem [thread:$0]  (!%p2382_p11), %s2760_s7, 2048, %s375_s10, [#allocation10], %s2250_s6, %s2250_s6, %s2251_s3  }
  0x6f   : > { %s2469_s9 = sand.u32 1, %s2231_s19   ;;  %s40_s16 = sadd.s32 1, %s2239_s21 }
  0x70   : > { %s1535_s17 = sshll.u32 %s2469_s9, 5  ;;  %p41_p8 = scmp.ge.s32.totalorder %s40_s16, 2 }
  0x71   : > { %s1628_s27 = sshll.u32 %s2239_s21, 8  ;;  %s395_s12 = scalar_lea.vmem [#allocation3], %s1535_s17 }
  0x72   : > { %s405_s14 = sshll.u32 %s395_s12, 4  ;;  %s2784_s16 = smov (%p41_p8, %s40_s16), 0  ;;  %s2481_s14 = int_to_ptr.vmem [resolvable:$true] %s405_s14 }
  0x73   : > { %s2761_s0 = sld [smem:[#allocation22_spill]]  ;;  %s48_s10 = ssub.s32 %s2239_s21, %s2784_s16 }
  0x74   : > { %p50_p11 = scmp.eq.s32.totalorder %s48_s10, 0  ;;  %s2762_s3 = sadd.s32 1, %s2231_s19 }
  0x75   : > { %s392_s24 = scalar_lea.sflag [#allocation4], %s2469_s9  ;;  %p2763_p0 = scmp.ne.s32.totalorder %s2756_s30, 0 }
  0x76   : > { %s2489_s8 = scalar_select %p50_p11, %s2231_s19, %s2762_s3  }
  0x77   : > { %p2037_p2 = pneg %p2763_p0 }
  0x79   : > { %s2479_s13 = scalar_lea.hbm %s2761_s0, %s1628_s27  ;;  %s2040_s28 = scalar_lea.hbm %s2761_s0, 1024 }
  0x7a   : > { %s2035_s17 = scalar_lea.hbm %s2479_s13, 512  ;;  %p2041_p7 = scmp.lt.u32.totalorder %s2479_s13, %s2761_s0 }
  0x7b   : > { %p2036_p12 = scmp.ne.s32.totalorder %s2479_s13, %s2035_s17  ;;  %p2042_p9 = scmp.lt.u32.totalorder %s2040_s28, %s2035_s17 }
  0x7c   : > { %p2044_p13 = scmp.lt.u32.totalorder %s2035_s17, %s2479_s13 }
  0x7d   : > { %p2038_p4 = pnand %p2037_p2, %p2036_p12  ;;  %p2043_p10 = por %p2042_p9, %p2041_p7 }
  0x7f   : > { %p2039_p5 = pneg %p2038_p4  ;;  %p2045_p1 = por %p2044_p13, %p2043_p10 }
  0x81   : > { %p2046_p3 = pnand %p2045_p1, %p2039_p5 }
  0x83   : > { %2049 = shalt.err (!%p2046_p3)
}
  0x84   : > { %s2050_s10 = scalar_lea.vmem %s2481_s14, 512  ;;  %s2252_s3 = smov [#allocation3]  }
  0x85   : > { %p2051_p6 = scmp.ne.s32.totalorder %s2481_s14, %s2050_s10  ;;  %s2055_s27 = sshll.u32 %s2252_s3, 4  ;;  %s2056_s27 = int_to_ptr.vmem [resolvable:$false] %s2055_s27 }
  0x86   : > { %s2057_s15 = scalar_lea.vmem %s2056_s27, 1024  ;;  %p2058_p12 = scmp.lt.s32.totalorder %s2481_s14, %s2056_s27 }
  0x87   : > { %p2053_p8 = pnand %p2051_p6, %p2037_p2  ;;  %p2059_p4 = scmp.lt.s32.totalorder %s2057_s15, %s2050_s10 }
  0x89   : > { %p2054_p11 = pneg %p2053_p8  ;;  %p2060_p7 = por %p2059_p4, %p2058_p12 }
  0x8b   : > { %p2061_p9 = pnand %p2060_p7, %p2054_p11 }
  0x8d   : > { %2064 = shalt.err (!%p2061_p9)
}
  0x8e   : > { %s2253_s17 = smov 512   ;;  %s2254_s12 = smov 256  }
  0x8f   : > { %s2255_s28 = smov 16   ;;  %s1538_s29 = sshll.u32 %s2469_s9, 8 }
  0x90   : > { %1773 = dma.hbm_to_vmem [thread:$0]  (!%p2763_p0), %s2479_s13, 512, %s2481_s14, %s392_s24, %s2253_s17, %s2254_s12, %s2255_s28  }
  0x91   : > { %s1629_s3 = sshll.u32 %s2239_s21, 12  ;;  %s419_s11 = scalar_lea.vmem [#allocation6], %s1538_s29 }
  0x92   : > { %s2524_s15 = scalar_lea.hbm %s2724_s1, %s1629_s3  ;;  %s426_s6 = sshll.u32 %s419_s11, 4  ;;  %s2526_s6 = int_to_ptr.vmem [resolvable:$true] %s426_s6 }
  0x93   : > { %s2764_s0 = sand.u32 1, %s2243_s22   ;;  %s2065_s7 = scalar_lea.hbm %s2524_s15, 4096 }
  0x94   : > { %s2530_s5 = scalar_lea.sflag [#allocation7], %s2764_s0  ;;  %p2066_p5 = scmp.ne.s32.totalorder %s2524_s15, %s2065_s7 }
  0x95   : > { %s2070_s13 = scalar_lea.hbm %s2724_s1, 8192  ;;  %p2071_p1 = scmp.lt.u32.totalorder %s2524_s15, %s2724_s1 }
  0x96   : > { %p2068_p10 = pnand %p2066_p5, %p2037_p2  ;;  %p2072_p3 = scmp.lt.u32.totalorder %s2070_s13, %s2065_s7 }
  0x97   : > { %p2074_p8 = scmp.lt.u32.totalorder %s2065_s7, %s2524_s15 }
  0x98   : > { %p2069_p13 = pneg %p2068_p10  ;;  %p2073_p6 = por %p2072_p3, %p2071_p1 }
  0x9a   : > { %p2075_p11 = por %p2074_p8, %p2073_p6 }
  0x9c   : > { %p2076_p12 = pnand %p2075_p11, %p2069_p13 }
  0x9e   : > { %2079 = shalt.err (!%p2076_p12)
}
  0x9f   : > { %s2080_s0 = scalar_lea.vmem %s2526_s6, 4096  ;;  %s2256_s11 = smov [#allocation6]  }
  0xa0   : > { %p2081_p4 = scmp.ne.s32.totalorder %s2526_s6, %s2080_s0  ;;  %s2085_s12 = sshll.u32 %s2256_s11, 4  ;;  %s2086_s12 = int_to_ptr.vmem [resolvable:$false] %s2085_s12 }
  0xa1   : > { %s2087_s28 = scalar_lea.vmem %s2086_s12, 8192  ;;  %p2088_p5 = scmp.lt.s32.totalorder %s2526_s6, %s2086_s12 }
  0xa2   : > { %p2083_p7 = pnand %p2081_p4, %p2037_p2  ;;  %p2089_p10 = scmp.lt.s32.totalorder %s2087_s28, %s2080_s0 }
  0xa4   : > { %p2084_p9 = pneg %p2083_p7  ;;  %p2090_p1 = por %p2089_p10, %p2088_p5 }
  0xa6   : > { %p2091_p3 = pnand %p2090_p1, %p2084_p9 }
  0xa8   : > { %2094 = shalt.err (!%p2091_p3)
}
  0xa9   : > { %s2765_s7 = smov 4   ;;  %s2766_s29 = smov 64  }
  0xaa   : > { %1776 = dma.hbm_to_vmem [thread:$0]  (!%p2763_p0), %s2524_s15, 4096, %s2526_s6, %s2530_s5, %s2766_s29, %s2766_s29, %s2765_s7  }
  0xab   : > { %p2767_p2 = scmp.ne.s32.totalorder %s2754_s26, 0 }
  0xac   : > { %s440_s3 = sand.u32 (!%p2767_p2), 1, %s2227_s18   ;;  %p2768_p13 = scmp.ne.s32.totalorder (!%p2767_p2), %s2753_s25, 0 }
  0xad   : > { %438 = sbr.rel (%p2767_p2) target bundleno = 1571 (0x623), region = 56  ;;  %s1542_s10 = sshll.u32 (!%p2767_p2), %s440_s3, 5 }
  0xae   : > { %s441_s27 = scalar_lea.sflag (!%p2767_p2), [#allocation4], %s440_s3  ;;  %s2562_s9 = scalar_lea.vmem (!%p2767_p2), [#allocation3], %s1542_s10 }
  0xb4   : > { %2198 = dma.done.wait (%p2768_p13), %s441_s27, 512  }
  0xb5   : > { %2200 = vsyncadd (%p2768_p13), %s441_s27, 4294966784  ;;  %s449_s30 = sand.u32 1, %s2355_s23   ;;  %s1543_s14 = sshll.u32 %s440_s3, 8 }
  0xb6   : > { %s450_s5 = scalar_lea.sflag [#allocation7], %s449_s30  ;;  %s2569_s6 = scalar_lea.vmem [#allocation6], %s1543_s14 }
  0xb7   : > { %2202 = dma.done.wait (%p2768_p13), %s450_s5, 4096  }
  0xb8   : > { %2204 = vsyncadd (%p2768_p13), %s450_s5, 4294963200  ;;  %p2769_p0 = scmp.eq.s32.totalorder %s2355_s23, 0 }
  0xba   : > { %2206 = dma.done.wait (%p2769_p0), [#allocation7], 1024   ;;  %p2770_p6 = pmov %p2769_p0 }
  0xbb   : > { %p2771_p8 = pmov %p2769_p0 }
  0xbc   : > { %2208 = vsyncadd (%p2770_p6), [#allocation7], 4294966272 }
  0xbd   : > { %2210 = dma.done.wait (%p2771_p8), [#allocation10], 3072   ;;  %p2772_p11 = pmov %p2769_p0 }
  0xbe   : > { %p1547_p12 = scmp.ne.s32.totalorder %s2235_s20, 0 }
  0xbf   : > { %2212 = vsyncadd (%p2772_p11), [#allocation10], 4294964224  ;;  %v2257_v0 = vmov (!%p1547_p12), 0.0  }
  0xc0   : > { %514 = sbr.rel (%p1547_p12) target bundleno = 199 (0xc7), region = 80  ;;  %515 = vst [vmem:[#allocation2] sm:$0xff] (!%p1547_p12), %v2257_v0  ;;  %516 = vst [vmem:[#allocation2 + $0x8] sm:$0xff] (!%p1547_p12), %v2257_v0 }
  0xc7 PF: > { %v1857_v1 = vld [vmem:[%s2569_s6 + $0x40] sm:$0xff]   ;;  %v1861_v5 = vld [vmem:[%s2569_s6 + $0x48] sm:$0xff]   ;;  %v1865_v9 = vld [vmem:[%s2569_s6 + $0x50] sm:$0xff]   ;;  %p1584_p4 = scmp.ne.s32.totalorder %s2235_s20, 1 }
  0xc8   : > { %v1858_v2 = vld [vmem:[%s2569_s6 + $0xc0] sm:$0xff]   ;;  %1630 = vmatprep.subr.bf16.mxu0 %v1857_v1  ;;  %v1862_v6 = vld [vmem:[%s2569_s6 + $0xc8] sm:$0xff]   ;;  %v1866_v10 = vld [vmem:[%s2569_s6 + $0xd0] sm:$0xff]   ;;  %v2258_v56 = vmov (!%p1584_p4), 0.0   ;;  %vm2259_vm0 = vmmov (!%p1584_p4), 0   ;;  %s2773_s17 = sld [smem:[#allocation25_spill]] (!%p1584_p4) }
  0xc9   : > { %v1859_v3 = vld [vmem:[%s2569_s6] sm:$0xff]   ;;  %1652 = vmatprep.subr.bf16.mxu1 %v1858_v2  ;;  %v1863_v7 = vld [vmem:[%s2569_s6 + $0x8] sm:$0xff]   ;;  %v1867_v11 = vld [vmem:[%s2569_s6 + $0x10] sm:$0xff]   ;;  %s2774_s12 = sld [smem:[#allocation27_spill]] (!%p1584_p4) }
  0xca   : > { %v1860_v4 = vld [vmem:[%s2569_s6 + $0x80] sm:$0xff]   ;;  %1631 = vmatpush3.bf16.msra.mxu0 %v1859_v3  ;;  %v1864_v8 = vld [vmem:[%s2569_s6 + $0x88] sm:$0xff]   ;;  %v1868_v12 = vld [vmem:[%s2569_s6 + $0x90] sm:$0xff]  }
  0xcb   : > { %1653 = vmatpush3.bf16.msra.mxu1 %v1860_v4  ;;  %1632 = vmatprep.subr.bf16.mxu0 %v1861_v5  ;;  %v1869_v13 = vld [vmem:[%s2569_s6 + $0x58] sm:$0xff]   ;;  %v1873_v17 = vld [vmem:[%s2569_s6 + $0x60] sm:$0xff]   ;;  %v1877_v21 = vld [vmem:[%s2569_s6 + $0x68] sm:$0xff]  }
  0xcc   : > { %1654 = vmatprep.subr.bf16.mxu1 %v1862_v6  ;;  %v1870_v14 = vld [vmem:[%s2569_s6 + $0xd8] sm:$0xff]   ;;  %v1874_v18 = vld [vmem:[%s2569_s6 + $0xe0] sm:$0xff]   ;;  %v1878_v22 = vld [vmem:[%s2569_s6 + $0xe8] sm:$0xff]  }
  0xcd   : > { %v1871_v15 = vld [vmem:[%s2569_s6 + $0x18] sm:$0xff]   ;;  %v1875_v19 = vld [vmem:[%s2569_s6 + $0x20] sm:$0xff]   ;;  %v1879_v23 = vld [vmem:[%s2569_s6 + $0x28] sm:$0xff]  }
  0xce   : > { %1633 = vmatpush3.bf16.msra.mxu0 %v1863_v7  ;;  %v1872_v16 = vld [vmem:[%s2569_s6 + $0x98] sm:$0xff]   ;;  %v1876_v20 = vld [vmem:[%s2569_s6 + $0xa0] sm:$0xff]   ;;  %v1880_v24 = vld [vmem:[%s2569_s6 + $0xa8] sm:$0xff]  }
  0xcf   : > { %1655 = vmatpush3.bf16.msra.mxu1 %v1864_v8  ;;  %1634 = vmatprep.subr.bf16.mxu0 %v1865_v9  ;;  %v1881_v25 = vld [vmem:[%s2569_s6 + $0x70] sm:$0xff]   ;;  %v1885_v29 = vld [vmem:[%s2569_s6 + $0x78] sm:$0xff]   ;;  %v1895_v55 = vld [vmem:[#allocation8] sm:$0xff] (!%p1584_p4)  }
  0xd0   : > { %1656 = vmatprep.subr.bf16.mxu1 %v1866_v10  ;;  %v1882_v26 = vld [vmem:[%s2569_s6 + $0xf0] sm:$0xff]   ;;  %v1886_v30 = vld [vmem:[%s2569_s6 + $0xf8] sm:$0xff]   ;;  %v1896_v57 = vld [vmem:[#allocation8 + $0x8] sm:$0xff] (!%p1584_p4)  }
  0xd1   : > { %v1883_v27 = vld [vmem:[%s2569_s6 + $0x30] sm:$0xff]   ;;  %v1887_v31 = vld [vmem:[%s2569_s6 + $0x38] sm:$0xff]   ;;  %v1903_v59 = vld [vmem:[#allocation9] sm:$0xff] (!%p1584_p4)  }
  0xd2   : > { %1635 = vmatpush3.bf16.msra.mxu0 %v1867_v11  ;;  %v1884_v28 = vld [vmem:[%s2569_s6 + $0xb0] sm:$0xff]   ;;  %v1888_v32 = vld [vmem:[%s2569_s6 + $0xb8] sm:$0xff]   ;;  %v1904_v61 = vld [vmem:[#allocation9 + $0x8] sm:$0xff] (!%p1584_p4)  }
  0xd3   : > { %1657 = vmatpush3.bf16.msra.mxu1 %v1868_v12  ;;  %1636 = vmatprep.subr.bf16.mxu0 %v1869_v13  ;;  %v1889_v33 = vld [vmem:[%s2562_s9] ss:$16 sps:$4 sm:$0xff]   ;;  %v1891_v34 = vld [vmem:[%s2562_s9 + $0x4] ss:$16 sps:$4 sm:$0xff]   ;;  %v1892_v35 = vld [vmem:[%s2562_s9 + $0x8] ss:$16 sps:$4 sm:$0xff]  }
  0xd4   : > { %1658 = vmatprep.subr.bf16.mxu1 %v1870_v14  ;;  %v1894_v36 = vld [vmem:[%s2562_s9 + $0xc] ss:$16 sps:$4 sm:$0xff]   ;;  %831 = vmatprep.mubr.bf16.mxu0 %v1891_v34  ;;  %v517_v46 = vld [vmem:[#allocation2] sm:$0xff]  ;;  %v1899_v62 = vld [vmem:[#allocation8 + $0x20] sm:$0xff] (!%p1584_p4)  }
  0xd5   : > { %872 = vmatprep.mubr.bf16.mxu1 %v1894_v36  ;;  %v518_v51 = vld [vmem:[#allocation2 + $0x8] sm:$0xff]  ;;  %v1897_v58 = vld [vmem:[#allocation8 + $0x10] sm:$0xff] (!%p1584_p4)   ;;  %v1900_v3 = vld [vmem:[#allocation8 + $0x28] sm:$0xff] (!%p1584_p4)  }
  0xd6   : > { %1637 = vmatpush3.bf16.msra.mxu0 %v1871_v15  ;;  %v1898_v60 = vld [vmem:[#allocation8 + $0x18] sm:$0xff] (!%p1584_p4)   ;;  %v1585_v1 = vld [vmem:[%s2725_s2] ss:$0 sm:$0xff] (!%p1584_p4)  ;;  %v1907_v10 = vld [vmem:[#allocation9 + $0x20] sm:$0xff] (!%p1584_p4)  }
  0xd7   : > { %1659 = vmatpush3.bf16.msra.mxu1 %v1872_v16  ;;  %1638 = vmatprep.subr.bf16.mxu0 %v1873_v17  ;;  %v1905_v2 = vld [vmem:[#allocation9 + $0x10] sm:$0xff] (!%p1584_p4)   ;;  %v1906_v5 = vld [vmem:[#allocation9 + $0x18] sm:$0xff] (!%p1584_p4)   ;;  %v1908_v14 = vld [vmem:[#allocation9 + $0x28] sm:$0xff] (!%p1584_p4)  }
  0xd8   : > { %1660 = vmatprep.subr.bf16.mxu1 %v1874_v18  ;;  %v1901_v7 = vld [vmem:[#allocation8 + $0x30] sm:$0xff] (!%p1584_p4)   ;;  %v1902_v11 = vld [vmem:[#allocation8 + $0x38] sm:$0xff] (!%p1584_p4)   ;;  %v1911_v18 = vld [vmem:[#allocation11] ss:$8 sps:$4 sm:$0xff] (!%p1584_p4)  }
  0xd9   : > { %v1909_v16 = vld [vmem:[#allocation9 + $0x30] sm:$0xff] (!%p1584_p4)   ;;  %v1910_v17 = vld [vmem:[#allocation9 + $0x38] sm:$0xff] (!%p1584_p4)  }
  0xda   : > { %1639 = vmatpush3.bf16.msra.mxu0 %v1875_v19  ;;  %v1913_v19 = vld [vmem:[#allocation11 + $0x4] ss:$8 sps:$4 sm:$0xff] (!%p1584_p4)  }
  0xdb   : > { %1661 = vmatpush3.bf16.msra.mxu1 %v1876_v20  ;;  %1640 = vmatprep.subr.bf16.mxu0 %v1877_v21  ;;  %v1916_v20 = vld [vmem:[#allocation11 + $0x14] ss:$8 sps:$4 sm:$0xff] (!%p1584_p4)   ;;  %v1914_v21 = vld [vmem:[#allocation11 + $0x10] ss:$8 sps:$4 sm:$0xff] (!%p1584_p4)  }
  0xdc   : > { %1662 = vmatprep.subr.bf16.mxu1 %v1878_v22  ;;  %v1919_v22 = vld [vmem:[#allocation11 + $0x24] ss:$8 sps:$4 sm:$0xff] (!%p1584_p4)  }
  0xde   : > { %1641 = vmatpush3.bf16.msra.mxu0 %v1879_v23  ;;  %v1917_v23 = vld [vmem:[#allocation11 + $0x20] ss:$8 sps:$4 sm:$0xff] (!%p1584_p4)  }
  0xdf   : > { %1663 = vmatpush3.bf16.msra.mxu1 %v1880_v24  ;;  %1642 = vmatprep.subr.bf16.mxu0 %v1881_v25  ;;  %v1922_v24 = vld [vmem:[#allocation11 + $0x34] ss:$8 sps:$4 sm:$0xff] (!%p1584_p4)   ;;  %v1920_v25 = vld [vmem:[#allocation11 + $0x30] ss:$8 sps:$4 sm:$0xff] (!%p1584_p4)  }
  0xe0   : > { %1664 = vmatprep.subr.bf16.mxu1 %v1882_v26  ;;  %v1925_v26 = vld [vmem:[#allocation11 + $0x44] ss:$8 sps:$4 sm:$0xff] (!%p1584_p4)  }
  0xe2   : > { %1643 = vmatpush3.bf16.msra.mxu0 %v1883_v27  ;;  %v1923_v27 = vld [vmem:[#allocation11 + $0x40] ss:$8 sps:$4 sm:$0xff] (!%p1584_p4)  }
  0xe3   : > { %1665 = vmatpush3.bf16.msra.mxu1 %v1884_v28  ;;  %1644 = vmatprep.subr.bf16.mxu0 %v1885_v29  ;;  %v1928_v28 = vld [vmem:[#allocation11 + $0x54] ss:$8 sps:$4 sm:$0xff] (!%p1584_p4)   ;;  %v1926_v29 = vld [vmem:[#allocation11 + $0x50] ss:$8 sps:$4 sm:$0xff] (!%p1584_p4)  }
  0xe4   : > { %1666 = vmatprep.subr.bf16.mxu1 %v1886_v30  ;;  %v1586_v30 = vld [vmem:[%s2727_s4] ss:$0 sm:$0xff] (!%p1584_p4) }
  0xe6   : > { %1645 = vmatpush3.bf16.msra.mxu0 %v1887_v31 }
  0xe7   : > { %1667 = vmatpush3.bf16.msra.mxu1 %v1888_v32  ;;  %1692 = vmatprep.subr.bf16.mxu0 (!%p1584_p4), %v2258_v56 }
  0xe8   : > { %1712 = vmatprep.subr.bf16.mxu1 (!%p1584_p4), %v2258_v56 }
  0xe9   : > { %832 = vmatmul.mubr.bf16.vlgmr.msra.gmra.mrb[0].mxu0 %v1889_v33 }
  0xea   : > { %873 = vmatmul.mubr.bf16.vlgmr.msra.gmra.mrb[0].mxu1 %v1892_v35  ;;  %1693 = vmatpush3.bf16.msra.mxu0 (!%p1584_p4), %v1895_v55 }
  0xeb   : > { %1708 = vmatprep.mubr.msk.bf16.mxu0 (!%p1584_p4), %vm2259_vm0, %v2258_v56  ;;  %1694 = vmatprep.subr.bf16.mxu0 (!%p1584_p4), %v2258_v56 }
  0xec   : > { %1728 = vmatprep.mubr.msk.bf16.mxu1 (!%p1584_p4), %vm2259_vm0, %v2258_v56  ;;  %1713 = vmatpush3.bf16.msra.mxu1 (!%p1584_p4), %v1903_v59  ;;  %v1163_v59 = vlaneseq (!%p1584_p4) }
  0xed   : > { %1714 = vmatprep.subr.bf16.mxu1 (!%p1584_p4), %v2258_v56 }
  0xee   : > { %1695 = vmatpush3.bf16.msra.mxu0 (!%p1584_p4), %v1896_v57 }
  0xef   : > { %1696 = vmatprep.subr.bf16.mxu0 (!%p1584_p4), %v2258_v56 }
  0xf0   : > { %1715 = vmatpush3.bf16.msra.mxu1 (!%p1584_p4), %v1904_v61 }
  0xf1   : > { %1716 = vmatprep.subr.bf16.mxu1 (!%p1584_p4), %v2258_v56 }
  0xf2   : > { %1697 = vmatpush3.bf16.msra.mxu0 (!%p1584_p4), %v1897_v58 }
  0xf3   : > { %1698 = vmatprep.subr.bf16.mxu0 (!%p1584_p4), %v2258_v56 }
  0xf4   : > { %1717 = vmatpush3.bf16.msra.mxu1 (!%p1584_p4), %v1905_v2 }
  0xf5   : > { %1718 = vmatprep.subr.bf16.mxu1 (!%p1584_p4), %v2258_v56 }
  0xf6   : > { %1699 = vmatpush3.bf16.msra.mxu0 (!%p1584_p4), %v1898_v60  ;;  %v1164_v60 = vshrl.u32 (!%p1584_p4), %v1163_v59, 7 }
  0xf7   : > { %1700 = vmatprep.subr.bf16.mxu0 (!%p1584_p4), %v2258_v56 }
  0xf8   : > { %1719 = vmatpush3.bf16.msra.mxu1 (!%p1584_p4), %v1906_v5  ;;  %v1165_v61 = vsub.s32 (!%p1584_p4), 0, %v1164_v60 }
  0xf9   : > { %1720 = vmatprep.subr.bf16.mxu1 (!%p1584_p4), %v2258_v56 }
  0xfa   : > { %1701 = vmatpush3.bf16.msra.mxu0 (!%p1584_p4), %v1899_v62  ;;  %v1161_v62 = vld [vmem:[%s2774_s12] sm:$0x3] (!%p1584_p4) }
  0xfb   : > { %1702 = vmatprep.subr.bf16.mxu0 (!%p1584_p4), %v2258_v56 }
  0xfc   : > { %1721 = vmatpush3.bf16.msra.mxu1 (!%p1584_p4), %v1907_v10 }
  0xfd   : > { %1722 = vmatprep.subr.bf16.mxu1 (!%p1584_p4), %v2258_v56 }
  0xfe   : > { %1703 = vmatpush3.bf16.msra.mxu0 (!%p1584_p4), %v1900_v3 }
  0xff   : > { %1704 = vmatprep.subr.bf16.mxu0 (!%p1584_p4), %v2258_v56 }
 0x100   : > { %1723 = vmatpush3.bf16.msra.mxu1 (!%p1584_p4), %v1908_v14 }
 0x101   : > { %1724 = vmatprep.subr.bf16.mxu1 (!%p1584_p4), %v2258_v56 }
 0x102   : > { %1705 = vmatpush3.bf16.msra.mxu0 (!%p1584_p4), %v1901_v7 }
 0x103   : > { %1706 = vmatprep.subr.bf16.mxu0 (!%p1584_p4), %v2258_v56 }
 0x104   : > { %1725 = vmatpush3.bf16.msra.mxu1 (!%p1584_p4), %v1909_v16 }
 0x105   : > { %1726 = vmatprep.subr.bf16.mxu1 (!%p1584_p4), %v2258_v56 }
 0x106   : > { %1707 = vmatpush3.bf16.msra.mxu0 (!%p1584_p4), %v1902_v11 }
 0x107   : > { %1253 = vmatprep.subr.bf16.mxu0 (!%p1584_p4), %v1913_v19 }
 0x108   : > { %1727 = vmatpush3.bf16.msra.mxu1 (!%p1584_p4), %v1910_v17 }
 0x1bc   : > { %v1646_v37 = vpop.f32.mrb[0].mxu0 }
 0x1bd   : > { %v1668_v38 = vpop.f32.mrb[0].mxu1  ;;  %v1647_v39 = vpop.f32.mrb[1].mxu0 }
 0x1be   : > { %v1648_v40 = vadd.f32 %v1647_v39, %v1646_v37  ;;  %v1669_v41 = vpop.f32.mrb[1].mxu1  ;;  %v1649_v42 = vpop.f32.mrb[2].mxu0 }
 0x1bf   : > { %v1670_v43 = vadd.f32 %v1669_v41, %v1668_v38  ;;  %v1671_v44 = vpop.f32.mrb[2].mxu1  ;;  %v1650_v45 = vpop.f32.mrb[3].mxu0 }
 0x1c0   : > { %v1651_v47 = vadd.f32 %v1650_v45, %v1649_v42  ;;  %v1672_v48 = vpop.f32.mrb[3].mxu1  ;;  %v1931_v42 = vld [vmem:[#allocation11 + $0x64] ss:$8 sps:$4 sm:$0xff] (!%p1584_p4)   ;;  %v1932_v45 = vld [vmem:[#allocation11 + $0x70] ss:$8 sps:$4 sm:$0xff] (!%p1584_p4)  }
 0x1c1   : > { %v875_v49 = vadd.f32 %v1670_v43, %v1648_v40  ;;  %v1673_v50 = vadd.f32 %v1672_v48, %v1671_v44  ;;  %888 = sbr.rel (%p1584_p4) target bundleno = 1481 (0x5c9), region = 84  ;;  %v1929_v43 = vld [vmem:[#allocation11 + $0x60] ss:$8 sps:$4 sm:$0xff] (!%p1584_p4)   ;;  %v1934_v44 = vld [vmem:[#allocation11 + $0x74] ss:$8 sps:$4 sm:$0xff] (!%p1584_p4)  }
 0x1c3   : > { %v881_v52 = vadd.f32 %v875_v49, %v517_v46  ;;  %v878_v53 = vadd.f32 %v1673_v50, %v1651_v47  ;;  %v2260_v46 = vmov (!%p1584_p4), 0   ;;  %v1595_v47 = vld [vmem:[%s2773_s17] ss:$0 sm:$0xff] (!%p1584_p4) }
 0x1c5   : > { %883 = vst [vmem:[#allocation2] sm:$0xff] %v881_v52  ;;  %v882_v54 = vadd.f32 %v878_v53, %v518_v51 }
 0x1c7   : > { %884 = vst [vmem:[#allocation2 + $0x8] sm:$0xff] %v882_v54 }
 0x1cc   : > { %v889_v63 = vld [vmem:[#allocation2] sm:$0xff] }
 0x1cd   : > { %v898_v4 = vadd.f32 %v1585_v1, %v889_v63  ;;  %v1169_v63 = vsub.s32 1, %v1164_v60 }
 0x1ce   : > { %v890_v0 = vld [vmem:[#allocation2 + $0x8] sm:$0xff] }
 0x1cf   : > { %v899_v6 = vadd.f32 %v1585_v1, %v890_v0  ;;  %v902_v8 = vmul.f32 0.01, %v898_v4  ;;  %vm900_vm1 = vcmp.ge.f32.partialorder %v898_v4, 0.0  ;;  %v1166_v0 = vrot.slane %v1161_v62, %v1165_v61 }
 0x1d0   : > { %v1170_v1 = vrot.slane %v1161_v62, %v1169_v63 }
 0x1d1   : > { %v903_v9 = vmul.f32 0.01, %v899_v6  ;;  %vm901_vm2 = vcmp.ge.f32.partialorder %v899_v6, 0.0  ;;  %v904_v12 = vsel %vm900_vm1, %v898_v4, %v902_v8 }
 0x1d3   : > { %v905_v13 = vsel %vm901_vm2, %v899_v6, %v903_v9 }
 0x1d4   : > { %v906_v15 = vpack.c.bf16 %v905_v13, %v904_v12 }
 0x1d6   : > { %1709 = vmatmul.mubr.bf16.vlgmr.msra.gmra.mrb[0].mxu0 %v906_v15 }
 0x1d7   : > { %1254 = vmatpush1.bf16.msra.mxu0 %v1911_v18  ;;  %1285 = vmatprep.mubr.bf16.mxu0 %v2260_v46 }
 0x1d8   : > { %1255 = vmatprep.subr.bf16.mxu0 %v1916_v20 }
 0x1db   : > { %1256 = vmatpush1.bf16.msra.mxu0 %v1914_v21 }
 0x1dc   : > { %1257 = vmatprep.subr.bf16.mxu0 %v1919_v22 }
 0x1df   : > { %1258 = vmatpush1.bf16.msra.mxu0 %v1917_v23 }
 0x1e0   : > { %1259 = vmatprep.subr.bf16.mxu0 %v1922_v24 }
 0x1e3   : > { %1260 = vmatpush1.bf16.msra.mxu0 %v1920_v25 }
 0x1e4   : > { %1261 = vmatprep.subr.bf16.mxu0 %v1925_v26 }
 0x1e7   : > { %1262 = vmatpush1.bf16.msra.mxu0 %v1923_v27 }
 0x1e8   : > { %1263 = vmatprep.subr.bf16.mxu0 %v1928_v28  ;;  %v1321_v28 = vand.u32 127, %v1163_v59 }
 0x1ea   : > { %vm1322_vm7 = vcmp.lt.s32.totalorder %v1321_v28, 20 }
 0x1eb   : > { %1264 = vmatpush1.bf16.msra.mxu0 %v1926_v29 }
 0x1ec   : > { %1265 = vmatprep.subr.bf16.mxu0 %v1931_v42 }
 0x1ef   : > { %1266 = vmatpush1.bf16.msra.mxu0 %v1929_v43 }
 0x1f0   : > { %1267 = vmatprep.subr.bf16.mxu0 %v1934_v44 }
 0x1f3   : > { %1268 = vmatpush1.bf16.msra.mxu0 %v1932_v45 }
 0x2a9   : > { %v1012_v31 = vpop.f32.mrb[0].mxu0 }
 0x2aa   : > { %v1013_v32 = vadd.f32 %v1586_v30, %v1012_v31  ;;  %v1710_v33 = vpop.f32.mrb[1].mxu0 }
 0x2ab   : > { %v1015_v34 = vpop.f32.mrb[2].mxu0 }
 0x2ac   : > { %v1021_v35 = vmul.f32 0.01, %v1013_v32  ;;  %v1016_v36 = vadd.f32 %v1586_v30, %v1015_v34  ;;  %v1711_v37 = vpop.f32.mrb[3].mxu0  ;;  %vm1019_vm3 = vcmp.ge.f32.partialorder %v1013_v32, 0.0 }
 0x2ae   : > { %vm1020_vm4 = vcmp.ge.f32.partialorder %v1016_v36, 0.0  ;;  %v1022_v38 = vmul.f32 0.01, %v1016_v36  ;;  %v1023_v39 = vsel %vm1019_vm3, %v1013_v32, %v1021_v35 }
 0x2b0   : > { %v1024_v40 = vsel %vm1020_vm4, %v1016_v36, %v1022_v38 }
 0x2b1   : > { %v1025_v41 = vpack.c.bf16 %v1024_v40, %v1023_v39 }
 0x2b3   : > { %1729 = vmatmul.mubr.bf16.vlgmr.msra.gmra.mrb[0].mxu1 %v1025_v41 }
 0x386   : > { %v1131_v48 = vpop.f32.mrb[0].mxu1 }
 0x387   : > { %v1132_v49 = vadd.f32 %v1595_v47, %v1131_v48  ;;  %v1730_v50 = vpop.f32.mrb[1].mxu1 }
 0x388   : > { %v1134_v51 = vpop.f32.mrb[2].mxu1 }
 0x389   : > { %v1140_v52 = vmul.f32 0.01, %v1132_v49  ;;  %v1135_v53 = vadd.f32 %v1595_v47, %v1134_v51  ;;  %v1731_v54 = vpop.f32.mrb[3].mxu1  ;;  %vm1138_vm5 = vcmp.ge.f32.partialorder %v1132_v49, 0.0 }
 0x38b   : > { %vm1139_vm6 = vcmp.ge.f32.partialorder %v1135_v53, 0.0  ;;  %v1141_v55 = vmul.f32 0.01, %v1135_v53  ;;  %v1142_v56 = vsel %vm1138_vm5, %v1132_v49, %v1140_v52 }
 0x38d   : > { %v1143_v57 = vsel %vm1139_vm6, %v1135_v53, %v1141_v55 }
 0x38e   : > { %v1144_v58 = vpack.c.bf16 %v1143_v57, %v1142_v56 }
 0x390   : > { %1286 = vmatmul.mubr.bf16.vlgmr.msra.gmra.mrb[4].mxu0 %v1144_v58 }
 0x463   : > { %v1287_v2 = vpop.f32.mrb[4].mxu0 }
 0x464   : > { %v1288_v3 = vadd.f32 %v1287_v2, %v1166_v0  ;;  %v1289_v4 = vpop.f32.mrb[5].mxu0 }
 0x465   : > { %v1290_v5 = vadd.f32 %v1289_v4, %v1170_v1  ;;  %v1291_v6 = vpop.f32.mrb[6].mxu0 }
 0x466   : > { %v1296_v7 = vmul.f32 0.999995, %v1288_v3  ;;  %v1292_v8 = vadd.f32 %v1291_v6, %v1166_v0  ;;  %v1293_v9 = vpop.f32.mrb[7].mxu0 }
 0x467   : > { %v1297_v10 = vmul.f32 0.999995, %v1290_v5  ;;  %v1294_v11 = vadd.f32 %v1293_v9, %v1170_v1 }
 0x468   : > { %1306 = vst [vmem:[#allocation12] sm:$0xff] %v1296_v7  ;;  %v1298_v12 = vmul.f32 0.999995, %v1292_v8 }
 0x469   : > { %v1300_v13 = vmul.f32 0.5, %v1297_v10  ;;  %v1299_v14 = vmul.f32 0.999995, %v1294_v11 }
 0x46a   : > { %1307 = vst [vmem:[#allocation12 + $0x8] sm:$0xff] %v1298_v12 }
 0x46b   : > { %v1302_v15 = vmul.f32 1.442695, %v1300_v13  ;;  %v1301_v16 = vmul.f32 0.5, %v1299_v14 }
 0x46d   : > { %1935 = vpow2.f32 %v1302_v15  ;;  %v1304_v17 = vmul.f32 1.442695, %v1301_v16 }
 0x46f   : > { %1937 = vpow2.f32 %v1304_v17 }
 0x477   : > { %v1936_v18 = vpop.eup %1935 }
 0x478   : > { %1308 = vst [vmem:[#allocation13] sm:$0xff] %v1936_v18  ;;  %v1310_v19 = vmul.f32 0.5, %v1936_v18 }
 0x479   : > { %v1938_v20 = vpop.eup %1937 }
 0x47a   : > { %1309 = vst [vmem:[#allocation13 + $0x8] sm:$0xff] %v1938_v20  ;;  %v1312_v21 = vmul.f32 %v1936_v18, %v1310_v19  ;;  %v1311_v22 = vmul.f32 0.5, %v1938_v20 }
 0x47c   : > { %v1314_v23 = vadd.f32 %v1312_v21, %v1296_v7  ;;  %v1313_v24 = vmul.f32 %v1938_v20, %v1311_v22 }
 0x47e   : > { %v1316_v25 = vmul.f32 1.442695, %v1314_v23  ;;  %v1315_v26 = vadd.f32 %v1313_v24, %v1298_v12 }
 0x480   : > { %1939 = vpow2.f32 %v1316_v25  ;;  %v1318_v27 = vmul.f32 1.442695, %v1315_v26 }
 0x482   : > { %1941 = vpow2.f32 %v1318_v27 }
 0x48a   : > { %v1940_v29 = vpop.eup %1939 }
 0x48b   : > { %v1323_v30 = vsel %vm1322_vm7, %v1940_v29, -1e+30 }
 0x48c   : > { %v1942_v31 = vpop.eup %1941  ;;  %1325 = vmax.xlane.f32.xlu0 %v1323_v30 }
 0x48d   : > { %v1324_v32 = vsel %vm1322_vm7, %v1942_v31, -1e+30 }
 0x490   : > { %1327 = vmax.xlane.f32.xlu0 %v1324_v32 }
 0x519   : > { %v1326_v33 = vpop.xlane.xlu0 %1325 }
 0x51a   : > { %v1329_v34 = vsub.f32 %v1323_v30, %v1326_v33 }
 0x51c   : > { %v1331_v35 = vmul.f32 1.442695, %v1329_v34 }
 0x51d   : > { %v1328_v36 = vpop.xlane.xlu0 %1327 }
 0x51e   : > { %1943 = vpow2.f32 %v1331_v35  ;;  %v1330_v37 = vsub.f32 %v1324_v32, %v1328_v36 }
 0x520   : > { %v1333_v38 = vmul.f32 1.442695, %v1330_v37 }
 0x522   : > { %1945 = vpow2.f32 %v1333_v38 }
 0x528   : > { %v1944_v39 = vpop.eup %1943 }
 0x529   : > { %1335 = vadd.xlane.f32.xlu1 %v1944_v39 }
 0x52c   : > { %v1946_v40 = vpop.eup %1945 }
 0x52d   : > { %1337 = vadd.xlane.f32.xlu1 %v1946_v40 }
 0x5b6   : > { %v1336_v41 = vpop.xlane.xlu1 %1335 }
 0x5b7   : > { %1947 = vrcp.f32 %v1336_v41 }
 0x5ba   : > { %v1338_v42 = vpop.xlane.xlu1 %1337 }
 0x5bb   : > { %1949 = vrcp.f32 %v1338_v42 }
 0x5c1   : > { %v1948_v43 = vpop.eup %1947 }
 0x5c2   : > { %v1341_v44 = vmul.f32 %v1948_v43, %v1944_v39 }
 0x5c4   : > { %1343 = vst [vmem:[#allocation15] sm:$0xff] %v1341_v44 }
 0x5c5   : > { %v1950_v45 = vpop.eup %1949 }
 0x5c6   : > { %v1342_v46 = vmul.f32 %v1950_v45, %v1946_v40 }
 0x5c8   : > { %1344 = vst [vmem:[#allocation15 + $0x8] sm:$0xff] %v1342_v46 }
 0x5c9 PF: > { %p1784_p7 = scmp.eq.s32.totalorder %s2355_s23, 1  ;;  %s2261_s28 = smov [#allocation13]  }
 0x5ca   : > { %s1370_s7 = sshll.u32 %s2261_s28, 4  ;;  %s1371_s7 = int_to_ptr.vmem [resolvable:$true] %s1370_s7 }
 0x5cb   : > { %s2095_s29 = scalar_lea.vmem %s1371_s7, 256  ;;  %p2102_p1 = scmp.lt.s32.totalorder %s1371_s7, %s1371_s7 }
 0x5cc   : > { %p2096_p9 = scmp.ne.s32.totalorder %s1371_s7, %s2095_s29  ;;  %p2103_p3 = scmp.lt.s32.totalorder %s2095_s29, %s2095_s29 }
 0x5ce   : > { %p2097_p5 = pnand %p2096_p9, %p1784_p7  ;;  %p2104_p2 = por %p2103_p3, %p2102_p1 }
 0x5d0   : > { %p2098_p10 = pneg %p2097_p5 }
 0x5d2   : > { %p2105_p13 = pnand %p2104_p2, %p2098_p10 }
 0x5d4   : > { %2108 = shalt.err (!%p2105_p13)
}
 0x5d5   : > { %s2775_s27 = sld [smem:[#allocation29_spill]] }
 0x5db   : > { %s2109_s9 = scalar_lea.hbm %s2775_s27, 256 }
 0x5dc   : > { %p2110_p0 = scmp.ne.s32.totalorder %s2775_s27, %s2109_s9  ;;  %p2115_p11 = scmp.lt.u32.totalorder %s2109_s9, %s2775_s27 }
 0x5de   : > { %p2111_p6 = pnand %p2110_p0, %p1784_p7 }
 0x5e0   : > { %p2112_p8 = pneg %p2111_p6 }
 0x5e2   : > { %p2117_p12 = pnand %p2115_p11, %p2112_p8 }
 0x5e4   : > { %2120 = shalt.err (!%p2117_p12)
}
 0x5e5   : > { %s2262_s20 = smov 128   ;;  %s2263_s25 = smov 8  }
 0x5e6   : > { %1751 = dma.vmem_to_hbm [thread:$0]  (%p1784_p7), %s1371_s7, 256, %s2775_s27, [#allocation14], %s2262_s20, %s2262_s20, %s2263_s25  }
 0x5e7   : > { %s2264_s13 = smov [#allocation12]   ;;  %s2265_s17 = smov [#allocation15]  }
 0x5e8   : > { %s1354_s24 = sshll.u32 %s2264_s13, 4  ;;  %s1386_s0 = sshll.u32 %s2265_s17, 4  ;;  %s1355_s24 = int_to_ptr.vmem [resolvable:$true] %s1354_s24  ;;  %s1387_s0 = int_to_ptr.vmem [resolvable:$true] %s1386_s0 }
 0x5e9   : > { %s2121_s11 = scalar_lea.vmem %s1355_s24, 256  ;;  %p2128_p10 = scmp.lt.s32.totalorder %s1355_s24, %s1355_s24 }
 0x5ea   : > { %p2122_p4 = scmp.ne.s32.totalorder %s1355_s24, %s2121_s11  ;;  %p2129_p1 = scmp.lt.s32.totalorder %s2121_s11, %s2121_s11 }
 0x5ec   : > { %p2123_p9 = pnand %p2122_p4, %p1784_p7  ;;  %p2130_p3 = por %p2129_p1, %p2128_p10 }
 0x5ee   : > { %p2124_p5 = pneg %p2123_p9 }
 0x5f0   : > { %p2131_p2 = pnand %p2130_p3, %p2124_p5 }
 0x5f2   : > { %2134 = shalt.err (!%p2131_p2)
}
 0x5f3   : > { %s2776_s29 = sld [smem:[#allocation28_spill]] }
 0x5f9   : > { %s2135_s7 = scalar_lea.hbm %s2776_s29, 256 }
 0x5fa   : > { %p2136_p13 = scmp.ne.s32.totalorder %s2776_s29, %s2135_s7  ;;  %p2141_p8 = scmp.lt.u32.totalorder %s2135_s7, %s2776_s29 }
 0x5fc   : > { %p2137_p0 = pnand %p2136_p13, %p1784_p7 }
 0x5fe   : > { %p2138_p6 = pneg %p2137_p0 }
 0x600   : > { %p2143_p11 = pnand %p2141_p8, %p2138_p6 }
 0x602   : > { %2146 = shalt.err (!%p2143_p11)
}
 0x603   : > { %1749 = dma.vmem_to_hbm [thread:$0]  (%p1784_p7), %s1355_s24, 256, %s2776_s29, [#allocation5], %s2262_s20, %s2262_s20, %s2263_s25  }
 0x604   : > { %s2147_s6 = scalar_lea.vmem %s1387_s0, 256  ;;  %p2154_p5 = scmp.lt.s32.totalorder %s1387_s0, %s1387_s0 }
 0x605   : > { %p2148_p12 = scmp.ne.s32.totalorder %s1387_s0, %s2147_s6  ;;  %p2155_p10 = scmp.lt.s32.totalorder %s2147_s6, %s2147_s6 }
 0x607   : > { %p2149_p4 = pnand %p2148_p12, %p1784_p7  ;;  %p2156_p1 = por %p2155_p10, %p2154_p5 }
 0x609   : > { %p2150_p9 = pneg %p2149_p4 }
 0x60b   : > { %p2157_p3 = pnand %p2156_p1, %p2150_p9 }
 0x60d   : > { %2160 = shalt.err (!%p2157_p3)
}
 0x60e   : > { %s2777_s13 = sld [smem:[#allocation30_spill]] }
 0x614   : > { %s2161_s17 = scalar_lea.hbm %s2777_s13, 256 }
 0x615   : > { %p2162_p2 = scmp.ne.s32.totalorder %s2777_s13, %s2161_s17  ;;  %p2167_p6 = scmp.lt.u32.totalorder %s2161_s17, %s2777_s13 }
 0x617   : > { %p2163_p13 = pnand %p2162_p2, %p1784_p7 }
 0x619   : > { %p2164_p0 = pneg %p2163_p13 }
 0x61b   : > { %p2169_p8 = pnand %p2167_p6, %p2164_p0 }
 0x61d   : > { %2172 = shalt.err (!%p2169_p8)
}
 0x61e   : > { %1753 = dma.vmem_to_hbm [thread:$0]  (%p1784_p7), %s1387_s0, 256, %s2777_s13, [#allocation14], %s2262_s20, %s2262_s20, %s2263_s25  }
 0x61f   : > { %2214 = dma.done.wait (%p1784_p7), [#allocation5], 256  }
 0x620   : > { %2216 = vsyncadd (%p1784_p7), [#allocation5], 4294967040 }
 0x621   : > { %2218 = dma.done.wait (%p1784_p7), [#allocation14], 512  }
 0x622   : > { %2220 = vsyncadd (%p1784_p7), [#allocation14], 4294966784 }
 0x623 PF: > { %s31_s22 = sadd.s32 1, %s2243_s22   ;;  %s2778_s17 = smov %s2227_s18 }
 0x624   : > { %p28_p11 = scmp.ge.s32.totalorder %s31_s22, 4   ;;  %s2779_s18 = smov %s2231_s19 }
 0x625   : > { %s2780_s19 = smov %s2489_s8  ;;  %s2781_s20 = smov %s2239_s21 }
 0x626   : > { %s2782_s21 = smov %s2784_s16  ;;  %30 = sbr.rel (!%p28_p11) target bundleno = 19 (0x13), region = 145 }
 0x62d   :  { %1410 = vsyncpa [#allocation4], 1 }
 0x62e   :  { %1412 = vsyncpa [#allocation4 + $0x1], 1 }
 0x62f   :  { %1413 = vsyncpa [#allocation7], 1 }
 0x630   :  { %1415 = vsyncpa [#allocation7 + $0x1], 1 }
 0x631   :  { %1416 = vsyncpa [#allocation10], 1 }
 0x632   :  { %1417 = vsyncpa [#allocation5], 1 }
 0x633   :  { %1419 = vsyncpa [#allocation5 + $0x1], 1 }
 0x634   :  { %1420 = vsyncpa [#allocation14], 1 }

</bundles_post_ra>
